<compile_context>
chip_gen: v7x
topology: tpu7x:2x2x1
jax: 0.10.0
libtpu: 0.0.40
codegen_flags: <defaults>
</compile_context>

<pallas_src>
import functools

import jax
import jax.numpy as jnp
from jax.experimental import pallas as pl
from jax.experimental.pallas import tpu as pltpu


def _round_up(x: int, m: int) -> int:
    return ((x + m - 1) // m) * m


def _masked_linear_relu_kernel(x_ref, w_ref, b_ref, o_ref):
    # x_ref: (TM, F_in)  input dtype      w_ref: (F_in, F_out) compute dtype
    # b_ref: (1, F_out)  f32              o_ref: (TM, F_out)   output dtype
    x = x_ref[...].astype(w_ref.dtype)            # in-kernel cast, hidden under DMA
    acc = jnp.dot(x, w_ref[...], preferred_element_type=jnp.float32)
    acc = acc + b_ref[...]                        # f32 bias broadcast over rows
    o_ref[...] = jnp.maximum(acc, 0.0).astype(o_ref.dtype)


def masked_forward(audio, audio_lengths, weight, bias,
                   *, block_m: int = 2048, compute_dtype=jnp.bfloat16):
    """Pallas equivalent of Masked(nn.Linear, nn.ReLU).forward.

    audio:         (B, T, F_in)   (any float dtype; cast to compute_dtype in-kernel)
    audio_lengths: (B,) int32     -- passed through unchanged
    weight:        (F_in, F_out)  (already transposed vs. torch's (out, in))
    bias:          (F_out,)
    returns (out, audio_lengths), out: (B, T, F_out), dtype = audio.dtype
    Set compute_dtype=jnp.float32 for exact f32 nn.Linear numerics.
    """
    B, T, F_in = audio.shape
    F_in_w, F_out = weight.shape
    assert F_in == F_in_w, "weight must be (F_in, F_out)"
    M = B * T

    # --- wrapper-side glue (no HBM passes over activations) ---
    x2d = audio.reshape(M, F_in)                     # contiguous reshape: free
    # TODO(synk): hoist the (tiny) weight/bias casts to parameter-load time.
    w = weight.astype(compute_dtype)
    b2d = bias.astype(jnp.float32).reshape(1, F_out)

    xbytes = jnp.dtype(audio.dtype).itemsize
    wbytes = jnp.dtype(compute_dtype).itemsize
    obytes = jnp.dtype(audio.dtype).itemsize

    # Row tile: multiple of 8, clamped to M, auto-shrunk to fit the VMEM budget.
    tm = max(8, min(_round_up(block_m, 8), _round_up(M, 8)))

    def vmem_need(tm_):
        return (2 * tm_ * F_in * xbytes          # double-buffered activation tiles
                + 2 * tm_ * F_out * obytes       # double-buffered output tiles
                + F_in * F_out * wbytes          # single-buffered resident weight
                + F_out * 4)                     # resident bias (f32)

    budget = 40 << 20                            # safe even for v7x's 64 MiB VMEM
    while tm > 8 and vmem_need(tm) > budget:
        tm = max(8, _round_up(tm // 2, 8))

    grid = (pl.cdiv(M, tm),)                     # ragged last tile handled by Pallas

    need = vmem_need(tm)
    vmem_limit = int(min(max(need + (4 << 20), 32 << 20), 48 << 20))
    vmem_limit = max(vmem_limit, need + (2 << 20))   # never clamp below requirement

    cost = pl.CostEstimate(
        flops=2 * M * F_in * F_out,
        transcendentals=0,
        bytes_accessed=(M * F_in * xbytes
                        + F_in * F_out * wbytes
                        + M * F_out * obytes
                        + F_out * 4),
    )

    out2d = pl.pallas_call(
        _masked_linear_relu_kernel,
        out_shape=jax.ShapeDtypeStruct((M, F_out), audio.dtype),
        grid=grid,
        in_specs=[
            # Row tile of activations (full F_in: no feature padding).
            pl.BlockSpec((tm, F_in), lambda i: (i, 0)),
            # VMEM-resident weight / bias: constant index_map, single buffer.
            pl.BlockSpec((F_in, F_out), lambda i: (0, 0),
                         pipeline_mode=pl.Buffered(1)),
            pl.BlockSpec((1, F_out), lambda i: (0, 0),
                         pipeline_mode=pl.Buffered(1)),
        ],
        out_specs=pl.BlockSpec((tm, F_out), lambda i: (i, 0)),
        compiler_params=pltpu.CompilerParams(
            dimension_semantics=("parallel",),   # row tiles independent (v7x 2xTC)
            vmem_limit_bytes=vmem_limit,
        ),
        cost_estimate=cost,
    )(x2d, w, b2d)

    # Masked wrapper semantics: lengths are returned untouched.
    # TODO(synk): if downstream code requires frames beyond audio_lengths to be
    # zeroed, add an iota-vs-length mask before the store; the spec does not.
    return out2d.reshape(B, T, F_out), audio_lengths


if __name__ == "__main__":
    # Small deterministic setup consistent with an audio (B, T, F) tensor.
    # block_m=32 so even this small demo exercises the tiled (grid > 1) path.
    B, T, F_in, F_out = 2, 64, 32, 32

    key = jax.random.PRNGKey(0)
    k_x, k_w, k_b = jax.random.split(key, 3)

    audio = jax.random.normal(k_x, (B, T, F_in), dtype=jnp.float32)
    audio_lengths = jnp.array([T, T - 14], dtype=jnp.int32)

    # Deterministic nn.Linear-style init: U(-1/sqrt(F_in), 1/sqrt(F_in)).
    bound = 1.0 / (F_in ** 0.5)
    weight = jax.random.uniform(k_w, (F_in, F_out), jnp.float32, -bound, bound)
    bias = jax.random.uniform(k_b, (F_out,), jnp.float32, -bound, bound)

    fwd = jax.jit(functools.partial(masked_forward, block_m=32))
    out, lens_out = fwd(audio, audio_lengths, weight, bias)
    out = jax.block_until_ready(out)
    lens_out = jax.block_until_ready(lens_out)

    # Reference with the same bf16-operand / f32-accumulate math as the kernel.
    xb = audio.reshape(B * T, F_in).astype(jnp.bfloat16).astype(jnp.float32)
    wb = weight.astype(jnp.bfloat16).astype(jnp.float32)
    ref = jnp.maximum(xb @ wb + bias, 0.0).reshape(B, T, F_out)

    assert out.shape == (B, T, F_out)
    assert out.dtype == audio.dtype
    assert jnp.allclose(out, ref, atol=2e-3, rtol=2e-3)
    assert jnp.array_equal(lens_out, audio_lengths)

    print("KERNEL_OK")
</pallas_src>

<mosaic_0001>
module attributes {stable_mosaic.version = 11 : i64} {
  func.func @_masked_linear_relu_kernel(%arg0: i32, %arg1: memref<32x32xf32, #tpu.memory_space<vmem>>, %arg2: memref<32x32xbf16, #tpu.memory_space<vmem>>, %arg3: memref<1x32xf32, #tpu.memory_space<vmem>>, %arg4: memref<32x32xf32, #tpu.memory_space<vmem>>) attributes {dimension_semantics = [#tpu.dimension_semantics<parallel>], iteration_bounds = array<i64: 4>, scalar_prefetch = 0 : i64, scratch_operands = 0 : i64, tpu.core_type = #tpu.core_type<tc>, window_params = [{transform_indices = @transform_0, window_bounds = array<i64: 32, 32>}, {pipeline_mode = #tpu.pipeline_mode<synchronous>, transform_indices = @transform_1, window_bounds = array<i64: 32, 32>}, {pipeline_mode = #tpu.pipeline_mode<synchronous>, transform_indices = @transform_2, window_bounds = array<i64: 1, 32>}, {transform_indices = @transform_3, window_bounds = array<i64: 32, 32>}]} {
    %c0 = arith.constant 0 : index
    %c0_0 = arith.constant 0 : index
    %0 = vector.load %arg1[%c0, %c0_0] : memref<32x32xf32, #tpu.memory_space<vmem>>, vector<32x32xf32>
    %1 = arith.truncf %0 : vector<32x32xf32> to vector<32x32xbf16>
    %c0_1 = arith.constant 0 : index
    %c0_2 = arith.constant 0 : index
    %2 = vector.load %arg2[%c0_1, %c0_2] : memref<32x32xbf16, #tpu.memory_space<vmem>>, vector<32x32xbf16>
    %cst = arith.constant dense<0.000000e+00> : vector<32x32xf32>
    %3 = tpu.matmul %1, %2, %cst {dimension_numbers = #tpu.dot_dimension_numbers<[1], [0], [0], [1], [0, 0, 1, 1], [], []>} : vector<32x32xbf16>, vector<32x32xbf16>, vector<32x32xf32> -> vector<32x32xf32>
    %c0_3 = arith.constant 0 : index
    %c0_4 = arith.constant 0 : index
    %4 = vector.load %arg3[%c0_3, %c0_4] : memref<1x32xf32, #tpu.memory_space<vmem>>, vector<1x32xf32>
    %5 = vector.broadcast %4 : vector<1x32xf32> to vector<32x32xf32>
    %6 = arith.addf %3, %5 : vector<32x32xf32>
    %cst_5 = arith.constant 0.000000e+00 : f32
    %7 = vector.broadcast %cst_5 : f32 to vector<32x32xf32>
    %8 = arith.maximumf %6, %7 : vector<32x32xf32>
    %c0_6 = arith.constant 0 : index
    %c0_7 = arith.constant 0 : index
    %9 = vector.load %arg4[%c0_6, %c0_7] : memref<32x32xf32, #tpu.memory_space<vmem>>, vector<32x32xf32>
    tpu.vector_store %arg4[%c0_6, %c0_7], %8 {strides = array<i32>} : memref<32x32xf32, #tpu.memory_space<vmem>>, vector<32x32xf32>,
    return
  }
  func.func @transform_0(%arg0: i32) -> (i32, i32) {
    %c0_i32 = arith.constant 0 : i32
    %c0_i32_0 = arith.constant 0 : i32
    return %arg0, %c0_i32 : i32, i32
  }
  func.func @transform_1(%arg0: i32) -> (i32, i32) {
    %c0_i32 = arith.constant 0 : i32
    %c0_i32_0 = arith.constant 0 : i32
    %c0_i32_1 = arith.constant 0 : i32
    return %c0_i32, %c0_i32_0 : i32, i32
  }
  func.func @transform_2(%arg0: i32) -> (i32, i32) {
    %c0_i32 = arith.constant 0 : i32
    %c0_i32_0 = arith.constant 0 : i32
    %c0_i32_1 = arith.constant 0 : i32
    return %c0_i32, %c0_i32_0 : i32, i32
  }
  func.func @transform_3(%arg0: i32) -> (i32, i32) {
    %c0_i32 = arith.constant 0 : i32
    %c0_i32_0 = arith.constant 0 : i32
    return %arg0, %c0_i32 : i32, i32
  }
}

</mosaic_0001>

<bundles_post_ra>
// kernel: masked_forward.1
= control target key start
LH: loop header
LB: loop body
LE: loop exit
PB: predicated region body
PF: predicated region fallthrough
CT: control target
= control target key end

     0   :  { %s390_s12 = smov 0   ;;  %s422_s0 = inlined_call_operand.vmem [shape: f32[128,32], index: 0, kind: input, shape index: {}]   ;;  %s423_s1 = inlined_call_operand.vmem [shape: bf16[32,32], index: 1, kind: input, shape index: {}]   ;;  %s424_s2 = inlined_call_operand.vmem [shape: f32[1,32], index: 2, kind: input, shape index: {}]   ;;  %s425_s3 = inlined_call_operand.vmem [shape: f32[128,32], index: 3, kind: output, shape index: {}]  }
   0x1 LB: > { %s324_s13 = sadd.s32 4294967295, %s368_s12   ;;  %p328_p0 = scmp.ge.s32.totalorder %s368_s12, 1  ;;  %s368_s12 = sphi %s390_s12, %s13_s12  }
   0x2   : > { %p138_p1 = scmp.lt.s32.totalorder %s368_s12, 5 }
   0x4   : > { %p139_p2 = pnand %p328_p0, %p138_p1 }
   0x5   : > { %v360_v0 = vld [vmem:[%s423_s1] sm:$0xff] (!%p139_p2)   ;;  %s329_s16 = sshll.u32 (!%p139_p2), %s324_s13, 2  ;;  %v361_v1 = vld [vmem:[%s423_s1 + $0x8] sm:$0xff] (!%p139_p2)   ;;  %vm204_vm0 = vcmask (!%p139_p2), 261120  }
   0x6   : > { %142 = sbr.rel (%p139_p2) target bundleno = 240 (0xf0), region = 32  ;;  %p163_p3 = scmp.lt.s32.totalorder (!%p139_p2), %s329_s16, 15  ;;  %344 = vmatprep.subr.bf16.mxu0 (!%p139_p2), %v360_v0  ;;  %v333_v8 = vld [vmem:[%s424_s2] ss:$0 sm:$0xff] (!%p139_p2) }
   0x7   : > { %345 = vmatpush3.bf16.msra.mxu0 (!%p139_p2), %v360_v0 }
   0x8   : > { %346 = vmatprep.subr.bf16.mxu0 (!%p139_p2), %v361_v1 }
   0xb   : > { %347 = vmatpush3.bf16.msra.mxu0 (!%p139_p2), %v361_v1 }
   0xd   : > { %s427_s16 = smov (!%p163_p3, %s329_s16), 15 }
   0xe   : > { %s330_s19 = sshll.u32 %s427_s16, 3 }
   0xf   : > { %s166_s22 = scalar_lea.vmem %s422_s0, %s330_s19  ;;  %s172_s27 = scalar_lea.vmem %s425_s3, %s330_s19 }
  0x10   : > { %v175_v2 = vld [vmem:[%s166_s22] sm:$0xff]  ;;  %v176_v3 = vld [vmem:[%s166_s22 + $0x8] sm:$0xff]  ;;  %v177_v4 = vld [vmem:[%s166_s22 + $0x10] sm:$0xff] }
  0x11   : > { %v179_v5 = vpack.c.bf16 %v176_v3, %v175_v2  ;;  %v178_v6 = vld [vmem:[%s166_s22 + $0x18] sm:$0xff] }
  0x12   : > { %v180_v7 = vpack.c.bf16 %v178_v6, %v177_v4 }
  0x13   : > { %348 = vmatprep.mubr.msk.bf16.mxu0 %vm204_vm0, %v179_v5 }
  0x14   : > { %349 = vmatmul.mubr.msk.bf16.vlgmr.msra.gmra.mrb[0].mxu0 %vm204_vm0, %v180_v7 }
  0xe7   : > { %v350_v9 = vpop.f32.mrb[0].mxu0 }
  0xe8   : > { %v254_v10 = vadd.f32 %v350_v9, %v333_v8  ;;  %v245_v11 = vpop.f32.mrb[1].mxu0 }
  0xe9   : > { %v246_v12 = vadd.f32 %v333_v8, %v245_v11  ;;  %v351_v13 = vpop.f32.mrb[2].mxu0 }
  0xea   : > { %v262_v14 = vmax.f32 %v254_v10, 0.0  ;;  %v257_v15 = vadd.f32 %v351_v13, %v333_v8  ;;  %v248_v16 = vpop.f32.mrb[3].mxu0 }
  0xeb   : > { %v260_v17 = vmax.f32 %v246_v12, 0.0  ;;  %v249_v18 = vadd.f32 %v333_v8, %v248_v16 }
  0xec   : > { %266 = vst.msk [vmem:[%s172_s27 + $0x10] sm:$0xff] %vm204_vm0, %v262_v14  ;;  %v263_v19 = vmax.f32 %v257_v15, 0.0 }
  0xed   : > { %264 = vst.msk [vmem:[%s172_s27] sm:$0xff] %vm204_vm0, %v260_v17  ;;  %v261_v20 = vmax.f32 %v249_v18, 0.0 }
  0xee   : > { %267 = vst.msk [vmem:[%s172_s27 + $0x18] sm:$0xff] %vm204_vm0, %v263_v19 }
  0xef   : > { %265 = vst.msk [vmem:[%s172_s27 + $0x8] sm:$0xff] %vm204_vm0, %v261_v20 }
  0xf0 PF: > { %s13_s12 = sadd.s32 1, %s368_s12  }
  0xf1   : > { %p10_p4 = scmp.ge.s32.totalorder %s13_s12, 6  }
  0xf3   :  { %12 = sbr.rel (!%p10_p4) target bundleno = 1 (0x1), region = 62 }

</bundles_post_ra>
